<compile_context>
chip_gen: v5e
topology: v5e:2x2
jax: 0.10.0
libtpu: 0.0.40
codegen_flags: <defaults>
</compile_context>

<pallas_src>
import functools

import jax
import jax.numpy as jnp
from jax.experimental import pallas as pl
from jax.experimental.pallas import tpu as pltpu


def _ffn_kernel(x_ref, w1t_ref, w2t_ref, o_ref, acc_ref):
    # x_ref:   (tm, H)       row tile of input
    # w1t_ref: (H, tf)       pre-transposed fc1 weight block
    # w2t_ref: (tf, H)       pre-transposed fc2 weight block
    # o_ref:   (tm, H)       output row tile (resident across filter axis)
    # acc_ref: (tm, H) f32   VMEM accumulator
    f = pl.program_id(1)

    @pl.when(f == 0)
    def _():
        acc_ref[...] = jnp.zeros_like(acc_ref)

    # fc1 block + ReLU (MXU + VPU), then fc2 partial sum (MXU).
    h = jnp.dot(x_ref[...], w1t_ref[...], preferred_element_type=jnp.float32)
    h = jnp.maximum(h, 0.0)
    # dropout: identity in eval mode.
    acc_ref[...] += jnp.dot(h.astype(w2t_ref.dtype), w2t_ref[...],
                            preferred_element_type=jnp.float32)

    @pl.when(f == pl.num_programs(1) - 1)
    def _():
        o_ref[...] = acc_ref[...].astype(o_ref.dtype)


@functools.partial(jax.jit, static_argnames=("tm", "tf", "compute_dtype"))
def feed_forward_network(x, w1, w2, *, tm=128, tf=512, compute_dtype=None):
    """x: (N, T, hidden); w1: (filter, hidden); w2: (hidden, filter).

    Weights are in PyTorch (out_features, in_features) layout; they are
    transposed once here (outside the grid loop) before the kernel runs.
    """
    N, T, H = x.shape
    F_out, H1 = w1.shape
    assert H == H1 and w2.shape == (H, F_out)

    dtype = x.dtype if compute_dtype is None else jnp.dtype(compute_dtype)
    itemsize = jnp.dtype(dtype).itemsize

    # One-time weight transposes (plain XLA, not per grid iteration).
    w1t = jnp.asarray(w1, dtype).T            # (H, F)
    w2t = jnp.asarray(w2, dtype).T            # (F, H)
    x2d = jnp.asarray(x, dtype).reshape(N * T, H)
    M = N * T

    # --- Row tiling: pad rows so tm | M_pad (zero rows -> zero outputs). ---
    tm = max(8, tm)
    M_pad = pl.cdiv(M, tm) * tm
    if M_pad != M:
        x2d = jnp.pad(x2d, ((0, M_pad - M), (0, 0)))

    # --- Filter tiling: block the reduction axis; pad with zeros if needed
    #     (zero W1 columns -> relu(0)=0 -> zero contribution through W2). ---
    if F_out <= tf:
        tf_eff, F_pad = F_out, F_out          # full-extent block, no constraint
    else:
        tf_eff = max(128, (tf // 128) * 128)  # strict sub-block: 128-aligned
        F_pad = pl.cdiv(F_out, tf_eff) * tf_eff
        if F_pad != F_out:
            w1t = jnp.pad(w1t, ((0, 0), (0, F_pad - F_out)))
            w2t = jnp.pad(w2t, ((0, F_pad - F_out), (0, 0)))

    grid = (M_pad // tm, F_pad // tf_eff)

    # --- VMEM budget: double-buffered x / W1 / W2 / out tiles + f32 acc. ---
    vmem_bytes = (2 * (tm * H + H * tf_eff + tf_eff * H + tm * H) * itemsize
                  + tm * H * 4)
    vmem_limit = min(max(int(vmem_bytes * 1.5) + (1 << 20), 4 << 20), 64 << 20)

    cost = pl.CostEstimate(
        flops=4 * M_pad * H * F_pad,          # 2*M*H*F (fc1) + 2*M*F*H (fc2)
        transcendentals=0,
        bytes_accessed=(2 * M_pad * H
                        + grid[0] * (H * F_pad + F_pad * H)) * itemsize,
    )

    out2d = pl.pallas_call(
        _ffn_kernel,
        out_shape=jax.ShapeDtypeStruct((M_pad, H), x.dtype),
        grid_spec=pltpu.PrefetchScalarGridSpec(
            num_scalar_prefetch=0,
            grid=grid,
            in_specs=[
                pl.BlockSpec((tm, H), lambda i, f: (i, 0)),       # x row tile
                pl.BlockSpec((H, tf_eff), lambda i, f: (0, f)),   # W1.T block
                pl.BlockSpec((tf_eff, H), lambda i, f: (f, 0)),   # W2.T block
            ],
            out_specs=pl.BlockSpec((tm, H), lambda i, f: (i, 0)),
            scratch_shapes=[pltpu.VMEM((tm, H), jnp.float32)],
        ),
        compiler_params=pltpu.CompilerParams(
            dimension_semantics=("parallel", "arbitrary"),
            vmem_limit_bytes=vmem_limit,
        ),
        cost_estimate=cost,
    )(x2d, w1t, w2t)

    return out2d[:M].reshape(N, T, H)


def _reference(x, w1, w2):
    h = jnp.maximum(jnp.einsum("nth,fh->ntf", x, w1), 0.0)
    return jnp.einsum("ntf,hf->nth", h, w2)


if __name__ == "__main__":
    # Small shapes consistent with the module: batch=2, seq=8, hidden=32, filter=64
    N, T, HIDDEN, FILTER = 2, 8, 32, 64
    dropout_p = 0.1  # unused in eval mode

    key = jax.random.PRNGKey(0)
    kx, k1, k2 = jax.random.split(key, 3)

    x = jax.random.normal(kx, (N, T, HIDDEN), dtype=jnp.float32)
    # weight init matches PyTorch: uniform_(-0.1, 0.1), no bias
    w1 = jax.random.uniform(k1, (FILTER, HIDDEN), minval=-0.1, maxval=0.1,
                            dtype=jnp.float32)
    w2 = jax.random.uniform(k2, (HIDDEN, FILTER), minval=-0.1, maxval=0.1,
                            dtype=jnp.float32)

    out = feed_forward_network(x, w1, w2)
    out = jax.block_until_ready(out)

    ref = _reference(x, w1, w2)
    assert out.shape == (N, T, HIDDEN)
    assert jnp.allclose(out, ref, atol=1e-5, rtol=1e-5), "mismatch vs reference"

    print("KERNEL_OK")
</pallas_src>

<mosaic_0001>
module attributes {stable_mosaic.version = 11 : i64} {
  func.func @_ffn_kernel(%arg0: i32, %arg1: i32, %arg2: memref<128x32xf32, #tpu.memory_space<vmem>>, %arg3: memref<32x64xf32, #tpu.memory_space<vmem>>, %arg4: memref<64x32xf32, #tpu.memory_space<vmem>>, %arg5: memref<128x32xf32, #tpu.memory_space<vmem>>, %arg6: memref<128x32xf32, #tpu.memory_space<vmem>>) attributes {dimension_semantics = [#tpu.dimension_semantics<parallel>, #tpu.dimension_semantics<arbitrary>], iteration_bounds = array<i64: 1, 1>, scalar_prefetch = 0 : i64, scratch_operands = 1 : i64, tpu.core_type = #tpu.core_type<tc>, window_params = [{transform_indices = @transform_0, window_bounds = array<i64: 128, 32>}, {transform_indices = @transform_1, window_bounds = array<i64: 32, 64>}, {transform_indices = @transform_2, window_bounds = array<i64: 64, 32>}, {transform_indices = @transform_3, window_bounds = array<i64: 128, 32>}]} {
    %c0_i32 = arith.constant 0 : i32
    %0 = arith.cmpi eq, %arg1, %c0_i32 : i32
    %1 = arith.extui %0 : i1 to i32
    %c0_i32_0 = arith.constant 0 : i32
    %2 = arith.cmpi ne, %1, %c0_i32_0 : i32
    scf.if %2 {
      %cst_14 = arith.constant 0.000000e+00 : f32
      %16 = vector.broadcast %cst_14 : f32 to vector<128x32xf32>
      %c0_15 = arith.constant 0 : index
      %c0_16 = arith.constant 0 : index
      %17 = vector.load %arg6[%c0_15, %c0_16] : memref<128x32xf32, #tpu.memory_space<vmem>>, vector<128x32xf32>
      tpu.vector_store %arg6[%c0_15, %c0_16], %16 {strides = array<i32>} : memref<128x32xf32, #tpu.memory_space<vmem>>, vector<128x32xf32>,
    } else {
    }
    %c0 = arith.constant 0 : index
    %c0_1 = arith.constant 0 : index
    %3 = vector.load %arg2[%c0, %c0_1] : memref<128x32xf32, #tpu.memory_space<vmem>>, vector<128x32xf32>
    %c0_2 = arith.constant 0 : index
    %c0_3 = arith.constant 0 : index
    %4 = vector.load %arg3[%c0_2, %c0_3] : memref<32x64xf32, #tpu.memory_space<vmem>>, vector<32x64xf32>
    %cst = arith.constant dense<0.000000e+00> : vector<128x64xf32>
    %5 = tpu.matmul %3, %4, %cst {dimension_numbers = #tpu.dot_dimension_numbers<[1], [0], [0], [1], [0, 0, 1, 1], [], []>} : vector<128x32xf32>, vector<32x64xf32>, vector<128x64xf32> -> vector<128x64xf32>
    %cst_4 = arith.constant 0.000000e+00 : f32
    %6 = vector.broadcast %cst_4 : f32 to vector<128x64xf32>
    %7 = arith.maximumf %5, %6 : vector<128x64xf32>
    %c0_5 = arith.constant 0 : index
    %c0_6 = arith.constant 0 : index
    %8 = vector.load %arg6[%c0_5, %c0_6] : memref<128x32xf32, #tpu.memory_space<vmem>>, vector<128x32xf32>
    %c0_7 = arith.constant 0 : index
    %c0_8 = arith.constant 0 : index
    %9 = vector.load %arg4[%c0_7, %c0_8] : memref<64x32xf32, #tpu.memory_space<vmem>>, vector<64x32xf32>
    %cst_9 = arith.constant dense<0.000000e+00> : vector<128x32xf32>
    %10 = tpu.matmul %7, %9, %cst_9 {dimension_numbers = #tpu.dot_dimension_numbers<[1], [0], [0], [1], [0, 0, 1, 1], [], []>} : vector<128x64xf32>, vector<64x32xf32>, vector<128x32xf32> -> vector<128x32xf32>
    %11 = arith.addf %8, %10 : vector<128x32xf32>
    %c0_10 = arith.constant 0 : index
    %c0_11 = arith.constant 0 : index
    %12 = vector.load %arg6[%c0_10, %c0_11] : memref<128x32xf32, #tpu.memory_space<vmem>>, vector<128x32xf32>
    tpu.vector_store %arg6[%c0_10, %c0_11], %11 {strides = array<i32>} : memref<128x32xf32, #tpu.memory_space<vmem>>, vector<128x32xf32>,
    %c0_i32_12 = arith.constant 0 : i32
    %13 = arith.cmpi eq, %arg1, %c0_i32_12 : i32
    %14 = arith.extui %13 : i1 to i32
    %c0_i32_13 = arith.constant 0 : i32
    %15 = arith.cmpi ne, %14, %c0_i32_13 : i32
    scf.if %15 {
      %c0_14 = arith.constant 0 : index
      %c0_15 = arith.constant 0 : index
      %16 = vector.load %arg6[%c0_14, %c0_15] : memref<128x32xf32, #tpu.memory_space<vmem>>, vector<128x32xf32>
      %c0_16 = arith.constant 0 : index
      %c0_17 = arith.constant 0 : index
      %17 = vector.load %arg5[%c0_16, %c0_17] : memref<128x32xf32, #tpu.memory_space<vmem>>, vector<128x32xf32>
      tpu.vector_store %arg5[%c0_16, %c0_17], %16 {strides = array<i32>} : memref<128x32xf32, #tpu.memory_space<vmem>>, vector<128x32xf32>,
    } else {
    }
    return
  }
  func.func @transform_0(%arg0: i32, %arg1: i32) -> (i32, i32) {
    %c0_i32 = arith.constant 0 : i32
    %c0_i32_0 = arith.constant 0 : i32
    return %arg0, %c0_i32 : i32, i32
  }
  func.func @transform_1(%arg0: i32, %arg1: i32) -> (i32, i32) {
    %c0_i32 = arith.constant 0 : i32
    %c0_i32_0 = arith.constant 0 : i32
    return %c0_i32, %arg1 : i32, i32
  }
  func.func @transform_2(%arg0: i32, %arg1: i32) -> (i32, i32) {
    %c0_i32 = arith.constant 0 : i32
    %c0_i32_0 = arith.constant 0 : i32
    return %arg1, %c0_i32 : i32, i32
  }
  func.func @transform_3(%arg0: i32, %arg1: i32) -> (i32, i32) {
    %c0_i32 = arith.constant 0 : i32
    %c0_i32_0 = arith.constant 0 : i32
    return %arg0, %c0_i32 : i32, i32
  }
}

</mosaic_0001>

<bundles_post_ra>
// kernel: feed_forward_network.1
= control target key start
LH: loop header
LB: loop body
LE: loop exit
PB: predicated region body
PF: predicated region fallthrough
CT: control target
= control target key end

     0   :  { %vm18_vm0 = vcmask 261120   ;;  %vm209_vm1 = vcmask 523264   ;;  %v439_v53 = vmov 0.0   ;;  %s672_s1 = inlined_call_operand.vmem [shape: f32[32,64], index: 1, kind: input, shape index: {}]   ;;  %s673_s0 = inlined_call_operand.vmem [shape: f32[128,32], index: 0, kind: input, shape index: {}]   ;;  %s674_s2 = inlined_call_operand.vmem [shape: f32[64,32], index: 2, kind: input, shape index: {}]   ;;  %s675_s3 = inlined_call_operand.vmem [shape: f32[128,32], index: 3, kind: output, shape index: {}]  }
   0x1   :  { %v54_v0 = vld [vmem:[%s672_s1 + $0x18] sm:$0xff]  ;;  %v53_v1 = vld [vmem:[%s672_s1 + $0x10] sm:$0xff]  ;;  %v52_v2 = vld [vmem:[%s672_s1 + $0x8] sm:$0xff]  ;;  %19 = vst.msk [vmem:[#allocation2] sm:$0xff] %vm18_vm0, %v439_v53 }
   0x2   :  { %116 = vmatpush.msra.mxu0 %v54_v0  ;;  %426 = vmatpush.msra.mxu3 %v54_v0  ;;  %v51_v3 = vld [vmem:[%s672_s1] sm:$0xff]  ;;  %v36_v5 = vld [vmem:[%s673_s0 + $0x8] sm:$0xff]  ;;  %v37_v6 = vld [vmem:[%s673_s0 + $0x10] sm:$0xff]  ;;  %20 = vst.msk [vmem:[#allocation2 + $0x8] sm:$0xff] %vm18_vm0, %v439_v53 }
   0x3   :  { %v35_v4 = vld [vmem:[%s673_s0] sm:$0xff]  ;;  %v38_v7 = vld [vmem:[%s673_s0 + $0x18] sm:$0xff]  ;;  %v44_v9 = vld [vmem:[%s673_s0 + $0x48] sm:$0xff]  ;;  %21 = vst.msk [vmem:[#allocation2 + $0x10] sm:$0xff] %vm18_vm0, %v439_v53 }
   0x4   :  { %117 = vmatpush.msra.mxu0 %v53_v1  ;;  %427 = vmatpush.msra.mxu3 %v53_v1  ;;  %v39_v8 = vld [vmem:[%s673_s0 + $0x20] sm:$0xff]  ;;  %v40_v10 = vld [vmem:[%s673_s0 + $0x28] sm:$0xff]  ;;  %v45_v11 = vld [vmem:[%s673_s0 + $0x50] sm:$0xff]  ;;  %22 = vst.msk [vmem:[#allocation2 + $0x18] sm:$0xff] %vm18_vm0, %v439_v53 }
   0x5   :  { %v208_v12 = vld [vmem:[%s674_s2 + $0x38] sm:$0xff]  ;;  %v41_v13 = vld [vmem:[%s673_s0 + $0x30] sm:$0xff]  ;;  %v206_v16 = vld [vmem:[%s674_s2 + $0x28] sm:$0xff]  ;;  %23 = vst.msk [vmem:[#allocation2 + $0x20] sm:$0xff] %vm18_vm0, %v439_v53 }
   0x6   :  { %118 = vmatpush.msra.mxu0 %v52_v2  ;;  %428 = vmatpush.msra.mxu3 %v52_v2  ;;  %v46_v14 = vld [vmem:[%s673_s0 + $0x58] sm:$0xff]  ;;  %v207_v15 = vld [vmem:[%s674_s2 + $0x30] sm:$0xff]  ;;  %v205_v17 = vld [vmem:[%s674_s2 + $0x20] sm:$0xff]  ;;  %24 = vst.msk [vmem:[#allocation2 + $0x28] sm:$0xff] %vm18_vm0, %v439_v53 }
   0x7   :  { %266 = vmatpush.msra.mxu1 %v208_v12  ;;  %430 = vmatpush.msra.mxu2 %v208_v12  ;;  %v42_v18 = vld [vmem:[%s673_s0 + $0x38] sm:$0xff]  ;;  %v47_v20 = vld [vmem:[%s673_s0 + $0x60] sm:$0xff]  ;;  %v203_v21 = vld [vmem:[%s674_s2 + $0x10] sm:$0xff]  ;;  %25 = vst.msk [vmem:[#allocation2 + $0x30] sm:$0xff] %vm18_vm0, %v439_v53 }
   0x8   :  { %119 = vmatpush.msra.mxu0 %v51_v3  ;;  %429 = vmatpush.msra.mxu3 %v51_v3  ;;  %v204_v19 = vld [vmem:[%s674_s2 + $0x18] sm:$0xff]  ;;  %v43_v22 = vld [vmem:[%s673_s0 + $0x40] sm:$0xff]  ;;  %v48_v23 = vld [vmem:[%s673_s0 + $0x68] sm:$0xff]  ;;  %26 = vst.msk [vmem:[#allocation2 + $0x38] sm:$0xff] %vm18_vm0, %v439_v53 }
   0x9   :  { %394 = vmatmul.msk.f32.vlgmr.msra.gmra.mxu0 %vm18_vm0, %v35_v4  ;;  %403 = vmatmul.msk.f32.vlgmr.msra.gmra.mxu3 %vm18_vm0, %v44_v9  ;;  %v49_v24 = vld [vmem:[%s673_s0 + $0x70] sm:$0xff]  ;;  %v50_v25 = vld [vmem:[%s673_s0 + $0x78] sm:$0xff]  ;;  %v202_v26 = vld [vmem:[%s674_s2 + $0x8] sm:$0xff]  ;;  %27 = vst.msk [vmem:[#allocation2 + $0x40] sm:$0xff] %vm18_vm0, %v439_v53 }
   0xa   :  { %267 = vmatpush.msra.mxu1 %v207_v15  ;;  %431 = vmatpush.msra.mxu2 %v207_v15  ;;  %v201_v27 = vld [vmem:[%s674_s2] sm:$0xff]  ;;  %28 = vst.msk [vmem:[#allocation2 + $0x48] sm:$0xff] %vm18_vm0, %v439_v53  ;;  %v186_v0 = vld [vmem:[#allocation2 + $0x8] sm:$0xff]  ;;  %v187_v4 = vld [vmem:[#allocation2 + $0x10] sm:$0xff] }
   0xb   :  { %29 = vst.msk [vmem:[#allocation2 + $0x50] sm:$0xff] %vm18_vm0, %v439_v53  ;;  %v185_v61 = vld [vmem:[#allocation2] sm:$0xff] }
   0xc   :  { %268 = vmatpush.msra.mxu1 %v206_v16  ;;  %432 = vmatpush.msra.mxu2 %v206_v16  ;;  %30 = vst.msk [vmem:[#allocation2 + $0x58] sm:$0xff] %vm18_vm0, %v439_v53  ;;  %v189_v12 = vld [vmem:[#allocation2 + $0x20] sm:$0xff] }
   0xd   :  { %31 = vst.msk [vmem:[#allocation2 + $0x60] sm:$0xff] %vm18_vm0, %v439_v53  ;;  %v190_v16 = vld [vmem:[#allocation2 + $0x28] sm:$0xff] }
   0xe   :  { %269 = vmatpush.msra.mxu1 %v205_v17  ;;  %433 = vmatpush.msra.mxu2 %v205_v17  ;;  %32 = vst.msk [vmem:[#allocation2 + $0x68] sm:$0xff] %vm18_vm0, %v439_v53 }
   0xf   :  { %33 = vst.msk [vmem:[#allocation2 + $0x70] sm:$0xff] %vm18_vm0, %v439_v53 }
  0x10   :  { %270 = vmatpush.msra.mxu1 %v204_v19  ;;  %434 = vmatpush.msra.mxu2 %v204_v19  ;;  %34 = vst.msk [vmem:[#allocation2 + $0x78] sm:$0xff] %vm18_vm0, %v439_v53 }
  0x11   :  { %395 = vmatmul.msk.f32.gmra.mxu0 %vm18_vm0, %v36_v5  ;;  %404 = vmatmul.msk.f32.gmra.mxu3 %vm18_vm0, %v45_v11 }
  0x12   :  { %271 = vmatpush.msra.mxu1 %v203_v21  ;;  %435 = vmatpush.msra.mxu2 %v203_v21 }
  0x14   :  { %272 = vmatpush.msra.mxu1 %v202_v26  ;;  %436 = vmatpush.msra.mxu2 %v202_v26 }
  0x16   :  { %273 = vmatpush.msra.mxu1 %v201_v27  ;;  %437 = vmatpush.msra.mxu2 %v201_v27 }
  0x19   :  { %396 = vmatmul.msk.f32.gmra.mxu0 %vm18_vm0, %v37_v6  ;;  %405 = vmatmul.msk.f32.gmra.mxu3 %vm18_vm0, %v46_v14 }
  0x21   :  { %397 = vmatmul.msk.f32.gmra.mxu0 %vm18_vm0, %v38_v7  ;;  %406 = vmatmul.msk.f32.gmra.mxu3 %vm18_vm0, %v47_v20  ;;  %v191_v20 = vld [vmem:[#allocation2 + $0x30] sm:$0xff] }
  0x29   :  { %398 = vmatmul.msk.f32.gmra.mxu0 %vm18_vm0, %v39_v8  ;;  %407 = vmatmul.msk.f32.gmra.mxu3 %vm18_vm0, %v48_v23  ;;  %v188_v8 = vld [vmem:[#allocation2 + $0x18] sm:$0xff] }
  0x31   :  { %399 = vmatmul.msk.f32.gmra.mxu0 %vm18_vm0, %v40_v10  ;;  %408 = vmatmul.msk.f32.gmra.mxu3 %vm18_vm0, %v49_v24  ;;  %v192_v24 = vld [vmem:[#allocation2 + $0x38] sm:$0xff] }
  0x39   :  { %400 = vmatmul.msk.f32.gmra.mxu0 %vm18_vm0, %v41_v13  ;;  %409 = vmatmul.msk.f32.gmra.mxu3 %vm18_vm0, %v50_v25 }
  0x41   :  { %401 = vmatmul.msk.f32.gmra.mxu0 %vm18_vm0, %v42_v18 }
  0x49   :  { %402 = vmatmul.msk.f32.gmra.mxu0 %vm18_vm0, %v43_v22 }
  0x86   :  { %v121_v28 = vpop.f32.mrf.mxu0 }
  0x87   :  { %v169_v29 = vmax.f32 %v121_v28, 0.0 }
  0x89   :  { %410 = vmatmul.msk.f32.vlgmr.msra.gmra.mxu1 %vm209_vm1, %v169_v29  ;;  %v193_v29 = vld [vmem:[#allocation2 + $0x40] sm:$0xff] }
  0x8c   :  { %v148_v43 = vpop.f32.mrf.mxu3 }
  0x8d   :  { %v178_v48 = vmax.f32 %v148_v43, 0.0 }
  0x8e   :  { %v124_v30 = vpop.f32.mrf.mxu0 }
  0x8f   :  { %v170_v31 = vmax.f32 %v124_v30, 0.0 }
  0x91   :  { %411 = vmatmul.msk.f32.gmra.mxu1 %vm209_vm1, %v170_v31 }
  0x94   :  { %v151_v47 = vpop.f32.mrf.mxu3 }
  0x95   :  { %v179_v50 = vmax.f32 %v151_v47, 0.0 }
  0x96   :  { %v127_v32 = vpop.f32.mrf.mxu0 }
  0x97   :  { %v171_v33 = vmax.f32 %v127_v32, 0.0  ;;  %v194_v32 = vld [vmem:[#allocation2 + $0x48] sm:$0xff] }
  0x99   :  { %412 = vmatmul.msk.f32.gmra.mxu1 %vm209_vm1, %v171_v33 }
  0x9c   :  { %v154_v49 = vpop.f32.mrf.mxu3 }
  0x9d   :  { %v180_v52 = vmax.f32 %v154_v49, 0.0 }
  0x9e   :  { %v130_v34 = vpop.f32.mrf.mxu0 }
  0x9f   :  { %v172_v35 = vmax.f32 %v130_v34, 0.0 }
  0xa1   :  { %413 = vmatmul.msk.f32.gmra.mxu1 %vm209_vm1, %v172_v35 }
  0xa4   :  { %v157_v51 = vpop.f32.mrf.mxu3 }
  0xa5   :  { %v181_v54 = vmax.f32 %v157_v51, 0.0 }
  0xa6   :  { %v133_v36 = vpop.f32.mrf.mxu0 }
  0xa7   :  { %v173_v37 = vmax.f32 %v133_v36, 0.0  ;;  %v195_v36 = vld [vmem:[#allocation2 + $0x50] sm:$0xff] }
  0xa9   :  { %414 = vmatmul.msk.f32.gmra.mxu1 %vm209_vm1, %v173_v37 }
  0xac   :  { %v160_v55 = vpop.f32.mrf.mxu3 }
  0xad   :  { %v182_v56 = vmax.f32 %v160_v55, 0.0 }
  0xae   :  { %v136_v38 = vpop.f32.mrf.mxu0 }
  0xaf   :  { %v174_v39 = vmax.f32 %v136_v38, 0.0 }
  0xb1   :  { %415 = vmatmul.msk.f32.gmra.mxu1 %vm209_vm1, %v174_v39 }
  0xb4   :  { %v163_v57 = vpop.f32.mrf.mxu3 }
  0xb5   :  { %v183_v58 = vmax.f32 %v163_v57, 0.0 }
  0xb6   :  { %v139_v40 = vpop.f32.mrf.mxu0 }
  0xb7   :  { %v175_v41 = vmax.f32 %v139_v40, 0.0  ;;  %v196_v40 = vld [vmem:[#allocation2 + $0x58] sm:$0xff] }
  0xb9   :  { %416 = vmatmul.msk.f32.gmra.mxu1 %vm209_vm1, %v175_v41 }
  0xbc   :  { %v166_v59 = vpop.f32.mrf.mxu3 }
  0xbd   :  { %v184_v60 = vmax.f32 %v166_v59, 0.0 }
  0xbe   :  { %v142_v42 = vpop.f32.mrf.mxu0 }
  0xbf   :  { %v176_v44 = vmax.f32 %v142_v42, 0.0 }
  0xc1   :  { %417 = vmatmul.msk.f32.gmra.mxu1 %vm209_vm1, %v176_v44  ;;  %v197_v44 = vld [vmem:[#allocation2 + $0x60] sm:$0xff] }
  0xc6   :  { %v145_v45 = vpop.f32.mrf.mxu0 }
  0xc7   :  { %v177_v46 = vmax.f32 %v145_v45, 0.0 }
  0xc9   :  { %418 = vmatmul.msk.f32.vlgmr.msra.gmra.mxu2 %vm209_vm1, %v177_v46 }
  0xd1   :  { %419 = vmatmul.msk.f32.gmra.mxu2 %vm209_vm1, %v178_v48  ;;  %v198_v48 = vld [vmem:[#allocation2 + $0x68] sm:$0xff] }
  0xd9   :  { %420 = vmatmul.msk.f32.gmra.mxu2 %vm209_vm1, %v179_v50 }
  0xe1   :  { %421 = vmatmul.msk.f32.gmra.mxu2 %vm209_vm1, %v180_v52  ;;  %v199_v52 = vld [vmem:[#allocation2 + $0x70] sm:$0xff] }
  0xe9   :  { %422 = vmatmul.msk.f32.gmra.mxu2 %vm209_vm1, %v181_v54 }
  0xf1   :  { %423 = vmatmul.msk.f32.gmra.mxu2 %vm209_vm1, %v182_v56  ;;  %v200_v56 = vld [vmem:[#allocation2 + $0x78] sm:$0xff] }
  0xf9   :  { %424 = vmatmul.msk.f32.gmra.mxu2 %vm209_vm1, %v183_v58 }
 0x101   :  { %425 = vmatmul.msk.f32.gmra.mxu2 %vm209_vm1, %v184_v60 }
 0x106   :  { %v275_v62 = vpop.f32.mrf.mxu1 }
 0x107   :  { %v323_v63 = vadd.f32 %v275_v62, %v185_v61 }
 0x109   :  { %339 = vst.msk [vmem:[#allocation2] sm:$0xff] %vm18_vm0, %v323_v63 }
 0x10e   :  { %v278_v1 = vpop.f32.mrf.mxu1 }
 0x10f   :  { %v324_v2 = vadd.f32 %v278_v1, %v186_v0 }
 0x110   :  { %v358_v3 = vld [vmem:[#allocation2] sm:$0xff] }
 0x111   :  { %374 = vst.msk [vmem:[%s675_s3] sm:$0xff] %vm18_vm0, %v358_v3 }
 0x112   :  { %340 = vst.msk [vmem:[#allocation2 + $0x8] sm:$0xff] %vm18_vm0, %v324_v2 }
 0x116   :  { %v281_v5 = vpop.f32.mrf.mxu1 }
 0x117   :  { %v325_v6 = vadd.f32 %v281_v5, %v187_v4 }
 0x119   :  { %v359_v7 = vld [vmem:[#allocation2 + $0x8] sm:$0xff]  ;;  %341 = vst.msk [vmem:[#allocation2 + $0x10] sm:$0xff] %vm18_vm0, %v325_v6 }
 0x11a   :  { %375 = vst.msk [vmem:[%s675_s3 + $0x8] sm:$0xff] %vm18_vm0, %v359_v7 }
 0x11e   :  { %v284_v9 = vpop.f32.mrf.mxu1 }
 0x11f   :  { %v326_v10 = vadd.f32 %v284_v9, %v188_v8 }
 0x120   :  { %v360_v11 = vld [vmem:[#allocation2 + $0x10] sm:$0xff] }
 0x121   :  { %376 = vst.msk [vmem:[%s675_s3 + $0x10] sm:$0xff] %vm18_vm0, %v360_v11 }
 0x122   :  { %342 = vst.msk [vmem:[#allocation2 + $0x18] sm:$0xff] %vm18_vm0, %v326_v10 }
 0x126   :  { %v287_v13 = vpop.f32.mrf.mxu1 }
 0x127   :  { %v327_v14 = vadd.f32 %v287_v13, %v189_v12 }
 0x129   :  { %v361_v15 = vld [vmem:[#allocation2 + $0x18] sm:$0xff]  ;;  %343 = vst.msk [vmem:[#allocation2 + $0x20] sm:$0xff] %vm18_vm0, %v327_v14 }
 0x12a   :  { %377 = vst.msk [vmem:[%s675_s3 + $0x18] sm:$0xff] %vm18_vm0, %v361_v15 }
 0x12e   :  { %v290_v17 = vpop.f32.mrf.mxu1 }
 0x12f   :  { %v328_v18 = vadd.f32 %v290_v17, %v190_v16 }
 0x130   :  { %v362_v19 = vld [vmem:[#allocation2 + $0x20] sm:$0xff] }
 0x131   :  { %378 = vst.msk [vmem:[%s675_s3 + $0x20] sm:$0xff] %vm18_vm0, %v362_v19 }
 0x132   :  { %344 = vst.msk [vmem:[#allocation2 + $0x28] sm:$0xff] %vm18_vm0, %v328_v18 }
 0x136   :  { %v293_v21 = vpop.f32.mrf.mxu1 }
 0x137   :  { %v329_v22 = vadd.f32 %v293_v21, %v191_v20 }
 0x139   :  { %v363_v23 = vld [vmem:[#allocation2 + $0x28] sm:$0xff]  ;;  %345 = vst.msk [vmem:[#allocation2 + $0x30] sm:$0xff] %vm18_vm0, %v329_v22 }
 0x13a   :  { %379 = vst.msk [vmem:[%s675_s3 + $0x28] sm:$0xff] %vm18_vm0, %v363_v23 }
 0x13e   :  { %v296_v25 = vpop.f32.mrf.mxu1 }
 0x13f   :  { %v330_v26 = vadd.f32 %v296_v25, %v192_v24 }
 0x140   :  { %v364_v27 = vld [vmem:[#allocation2 + $0x30] sm:$0xff] }
 0x141   :  { %380 = vst.msk [vmem:[%s675_s3 + $0x30] sm:$0xff] %vm18_vm0, %v364_v27 }
 0x142   :  { %346 = vst.msk [vmem:[#allocation2 + $0x38] sm:$0xff] %vm18_vm0, %v330_v26 }
 0x149   :  { %v365_v28 = vld [vmem:[#allocation2 + $0x38] sm:$0xff] }
 0x14a   :  { %381 = vst.msk [vmem:[%s675_s3 + $0x38] sm:$0xff] %vm18_vm0, %v365_v28 }
 0x14c   :  { %v299_v30 = vpop.f32.mrf.mxu2 }
 0x14d   :  { %v331_v31 = vadd.f32 %v299_v30, %v193_v29 }
 0x14f   :  { %347 = vst.msk [vmem:[#allocation2 + $0x40] sm:$0xff] %vm18_vm0, %v331_v31 }
 0x154   :  { %v302_v33 = vpop.f32.mrf.mxu2 }
 0x155   :  { %v332_v34 = vadd.f32 %v302_v33, %v194_v32 }
 0x156   :  { %v366_v35 = vld [vmem:[#allocation2 + $0x40] sm:$0xff] }
 0x157   :  { %382 = vst.msk [vmem:[%s675_s3 + $0x40] sm:$0xff] %vm18_vm0, %v366_v35 }
 0x158   :  { %348 = vst.msk [vmem:[#allocation2 + $0x48] sm:$0xff] %vm18_vm0, %v332_v34 }
 0x15c   :  { %v305_v37 = vpop.f32.mrf.mxu2 }
 0x15d   :  { %v333_v38 = vadd.f32 %v305_v37, %v195_v36 }
 0x15f   :  { %v367_v39 = vld [vmem:[#allocation2 + $0x48] sm:$0xff]  ;;  %349 = vst.msk [vmem:[#allocation2 + $0x50] sm:$0xff] %vm18_vm0, %v333_v38 }
 0x160   :  { %383 = vst.msk [vmem:[%s675_s3 + $0x48] sm:$0xff] %vm18_vm0, %v367_v39 }
 0x164   :  { %v308_v41 = vpop.f32.mrf.mxu2 }
 0x165   :  { %v334_v42 = vadd.f32 %v308_v41, %v196_v40 }
 0x166   :  { %v368_v43 = vld [vmem:[#allocation2 + $0x50] sm:$0xff] }
 0x167   :  { %384 = vst.msk [vmem:[%s675_s3 + $0x50] sm:$0xff] %vm18_vm0, %v368_v43 }
 0x168   :  { %350 = vst.msk [vmem:[#allocation2 + $0x58] sm:$0xff] %vm18_vm0, %v334_v42 }
 0x16c   :  { %v311_v45 = vpop.f32.mrf.mxu2 }
 0x16d   :  { %v335_v46 = vadd.f32 %v311_v45, %v197_v44 }
 0x16f   :  { %v369_v47 = vld [vmem:[#allocation2 + $0x58] sm:$0xff]  ;;  %351 = vst.msk [vmem:[#allocation2 + $0x60] sm:$0xff] %vm18_vm0, %v335_v46 }
 0x170   :  { %385 = vst.msk [vmem:[%s675_s3 + $0x58] sm:$0xff] %vm18_vm0, %v369_v47 }
 0x174   :  { %v314_v49 = vpop.f32.mrf.mxu2 }
 0x175   :  { %v336_v50 = vadd.f32 %v314_v49, %v198_v48 }
 0x176   :  { %v370_v51 = vld [vmem:[#allocation2 + $0x60] sm:$0xff] }
 0x177   :  { %386 = vst.msk [vmem:[%s675_s3 + $0x60] sm:$0xff] %vm18_vm0, %v370_v51 }
 0x178   :  { %352 = vst.msk [vmem:[#allocation2 + $0x68] sm:$0xff] %vm18_vm0, %v336_v50 }
 0x17c   :  { %v317_v53 = vpop.f32.mrf.mxu2 }
 0x17d   :  { %v337_v54 = vadd.f32 %v317_v53, %v199_v52 }
 0x17f   :  { %v371_v55 = vld [vmem:[#allocation2 + $0x68] sm:$0xff]  ;;  %353 = vst.msk [vmem:[#allocation2 + $0x70] sm:$0xff] %vm18_vm0, %v337_v54 }
 0x180   :  { %387 = vst.msk [vmem:[%s675_s3 + $0x68] sm:$0xff] %vm18_vm0, %v371_v55 }
 0x184   :  { %v320_v57 = vpop.f32.mrf.mxu2 }
 0x185   :  { %v338_v58 = vadd.f32 %v320_v57, %v200_v56 }
 0x186   :  { %v372_v59 = vld [vmem:[#allocation2 + $0x70] sm:$0xff] }
 0x187   :  { %388 = vst.msk [vmem:[%s675_s3 + $0x70] sm:$0xff] %vm18_vm0, %v372_v59 }
 0x188   :  { %354 = vst.msk [vmem:[#allocation2 + $0x78] sm:$0xff] %vm18_vm0, %v338_v58 }
 0x18f   :  { %v373_v60 = vld [vmem:[#allocation2 + $0x78] sm:$0xff] }
 0x190   :  { %389 = vst.msk [vmem:[%s675_s3 + $0x78] sm:$0xff] %vm18_vm0, %v373_v60 }

</bundles_post_ra>
